<compile_context>
chip_gen: v7x
topology: tpu7x:2x2x1
jax: 0.10.0
libtpu: 0.0.40
codegen_flags: <defaults>
</compile_context>

<pallas_src>
import functools

import jax
import jax.numpy as jnp
from jax.experimental import pallas as pl
from jax.experimental.pallas import tpu as pltpu

NEG_SLOPE = 0.01     # F.leaky_relu default
LN_EPS = 1e-5        # nn.LayerNorm default
L1_DIM = 400
L2_DIM = 300


def _round_up(n, m):
    return ((n + m - 1) // m) * m


def _leaky_relu(x):
    return jnp.where(x > 0, x, NEG_SLOPE * x)


def _masked_layer_norm(x, gamma, beta, true_dim):
    """LayerNorm over the last axis, ignoring padded lanes >= true_dim."""
    padded = x.shape[-1]
    if padded == true_dim:
        mean = jnp.mean(x, axis=-1, keepdims=True)
        centered = x - mean
        var = jnp.mean(centered * centered, axis=-1, keepdims=True)
    else:
        lane = jax.lax.broadcasted_iota(jnp.int32, (1, padded), 1)
        mask = lane < true_dim
        inv_n = 1.0 / float(true_dim)
        xm = jnp.where(mask, x, 0.0)
        mean = jnp.sum(xm, axis=-1, keepdims=True) * inv_n
        centered = jnp.where(mask, x - mean, 0.0)
        var = jnp.sum(centered * centered, axis=-1, keepdims=True) * inv_n
    inv = jax.lax.rsqrt(var + LN_EPS)
    return (x - mean) * inv * gamma + beta


def _critic_kernel(layer_norm, h1_true, h2_true,
                   x_ref, u_ref,
                   w1x_ref, w1u_ref, b1_ref, g1_ref, be1_ref,
                   w2_ref, b2_ref, g2_ref, be2_ref,
                   w3_ref, b3_ref,
                   out_ref):
    mxu = jnp.bfloat16

    # ---- layer 1: split matmul replaces lane-axis concat -------------------
    h = (jnp.dot(x_ref[...].astype(mxu), w1x_ref[...],
                 preferred_element_type=jnp.float32)
         + jnp.dot(u_ref[...].astype(mxu), w1u_ref[...],
                   preferred_element_type=jnp.float32)
         + b1_ref[...])
    if layer_norm:
        h = _masked_layer_norm(h, g1_ref[...], be1_ref[...], h1_true)
    h = _leaky_relu(h)

    # ---- layer 2 ------------------------------------------------------------
    h = jnp.dot(h.astype(mxu), w2_ref[...],
                preferred_element_type=jnp.float32) + b2_ref[...]
    if layer_norm:
        h = _masked_layer_norm(h, g2_ref[...], be2_ref[...], h2_true)
    h = _leaky_relu(h)

    # ---- layer 3 (hidden -> 1): VPU mul + lane reduction, not a 1-col dot ---
    q = jnp.sum(h * w3_ref[...], axis=-1, keepdims=True) + b3_ref[...]
    out_ref[...] = q.astype(out_ref.dtype)


def critic_forward(x, u, packed, *, layer_norm=True, batch_block=128):
    """x: (B, state_dim) f32, u: (B, action_dim) f32 -> (B, 1) f32."""
    B, state_dim = x.shape
    action_dim = u.shape[1]
    H1P = packed["w1x"].shape[1]
    H2P = packed["w2"].shape[1]

    # Batch tiling: pad batch to a multiple of the block, grid over blocks.
    bb = min(batch_block, _round_up(B, 8))
    Bp = _round_up(B, bb)
    if Bp != B:
        x = jnp.pad(x, ((0, Bp - B), (0, 0)))
        u = jnp.pad(u, ((0, Bp - B), (0, 0)))
    grid = (Bp // bb,)

    args = (
        x, u,
        packed["w1x"], packed["w1u"], packed["b1"], packed["g1"], packed["be1"],
        packed["w2"], packed["b2"], packed["g2"], packed["be2"],
        packed["w3"], packed["b3"],
    )

    batch_map = lambda i: (i, 0)
    const_map = lambda i: (0, 0)
    in_specs = [
        pl.BlockSpec((bb, state_dim), batch_map),
        pl.BlockSpec((bb, action_dim), batch_map),
        pl.BlockSpec((state_dim, H1P), const_map),
        pl.BlockSpec((action_dim, H1P), const_map),
        pl.BlockSpec((1, H1P), const_map),
        pl.BlockSpec((1, H1P), const_map),
        pl.BlockSpec((1, H1P), const_map),
        pl.BlockSpec((H1P, H2P), const_map),
        pl.BlockSpec((1, H2P), const_map),
        pl.BlockSpec((1, H2P), const_map),
        pl.BlockSpec((1, H2P), const_map),
        pl.BlockSpec((1, H2P), const_map),
        pl.BlockSpec((1, 1), const_map),
    ]
    out_specs = pl.BlockSpec((bb, 1), batch_map)

    flops = 2 * Bp * (state_dim * H1P + action_dim * H1P + H1P * H2P + H2P)
    bytes_accessed = int(sum(a.size * a.dtype.itemsize for a in args) + Bp * 4)
    cost = pl.CostEstimate(
        flops=flops,
        transcendentals=(2 * Bp if layer_norm else 0),
        bytes_accessed=bytes_accessed,
    )

    out = pl.pallas_call(
        functools.partial(_critic_kernel, layer_norm, L1_DIM, L2_DIM),
        grid=grid,
        in_specs=in_specs,
        out_specs=out_specs,
        out_shape=jax.ShapeDtypeStruct((Bp, 1), jnp.float32),
        compiler_params=pltpu.CompilerParams(
            dimension_semantics=("parallel",)),
        cost_estimate=cost,
    )(*args)
    return out[:B]


def init_params(key, state_dim, action_dim, l1_dim=L1_DIM, l2_dim=L2_DIM):
    """Logical (unpadded, f32) parameters, PyTorch-style uniform fan-in init.
    Linear weights stored transposed: (in, out)."""
    ks = jax.random.split(key, 6)

    def lin(kw, kb, fan_in, fan_out):
        bound = 1.0 / jnp.sqrt(fan_in)
        w = jax.random.uniform(kw, (fan_in, fan_out), jnp.float32, -bound, bound)
        b = jax.random.uniform(kb, (1, fan_out), jnp.float32, -bound, bound)
        return w, b

    in_dim = state_dim + action_dim
    w1, b1 = lin(ks[0], ks[1], in_dim, l1_dim)
    w2, b2 = lin(ks[2], ks[3], l1_dim, l2_dim)
    w3, b3 = lin(ks[4], ks[5], l2_dim, 1)
    return {
        "w1": w1, "b1": b1,
        "g1": jnp.ones((1, l1_dim), jnp.float32),
        "be1": jnp.zeros((1, l1_dim), jnp.float32),
        "w2": w2, "b2": b2,
        "g2": jnp.ones((1, l2_dim), jnp.float32),
        "be2": jnp.zeros((1, l2_dim), jnp.float32),
        "w3": w3, "b3": b3,
    }


def pack_params(p, state_dim, action_dim, l1_dim=L1_DIM, l2_dim=L2_DIM,
                mxu_dtype=jnp.bfloat16):
    """Split W1, lane-pad hidden dims (400->512, 300->384), cast MXU weights."""
    H1P = _round_up(l1_dim, 128)
    H2P = _round_up(l2_dim, 128)

    def pad_cols(a, target, value=0.0):
        return jnp.pad(a, ((0, 0), (0, target - a.shape[1])),
                       constant_values=value)

    def pad_rows(a, target):
        return jnp.pad(a, ((0, target - a.shape[0]), (0, 0)))

    w1 = p["w1"]                       # (state+action, l1)
    w1x, w1u = w1[:state_dim], w1[state_dim:]
    return {
        "w1x": pad_cols(w1x, H1P).astype(mxu_dtype),
        "w1u": pad_cols(w1u, H1P).astype(mxu_dtype),
        "b1": pad_cols(p["b1"], H1P),
        "g1": pad_cols(p["g1"], H1P, value=1.0),
        "be1": pad_cols(p["be1"], H1P),
        "w2": pad_cols(pad_rows(p["w2"], H1P), H2P).astype(mxu_dtype),
        "b2": pad_cols(p["b2"], H2P),
        "g2": pad_cols(p["g2"], H2P, value=1.0),
        "be2": pad_cols(p["be2"], H2P),
        "w3": pad_cols(p["w3"].T, H2P),      # (1, H2P) f32 row
        "b3": p["b3"],                       # (1, 1) f32
    }


def _reference(x, u, p, layer_norm):
    def ln(h, g, b):
        mean = jnp.mean(h, axis=-1, keepdims=True)
        var = jnp.mean((h - mean) ** 2, axis=-1, keepdims=True)
        return (h - mean) * jax.lax.rsqrt(var + LN_EPS) * g + b

    xu = jnp.concatenate([x, u], axis=1)
    h = xu @ p["w1"] + p["b1"]
    if layer_norm:
        h = ln(h, p["g1"], p["be1"])
    h = _leaky_relu(h)
    h = h @ p["w2"] + p["b2"]
    if layer_norm:
        h = ln(h, p["g2"], p["be2"])
    h = _leaky_relu(h)
    return h @ p["w3"] + p["b3"]


if __name__ == "__main__":
    state_dim, action_dim, batch = 16, 8, 8
    key = jax.random.PRNGKey(0)
    k_x, k_u, k_p = jax.random.split(key, 3)

    x = jax.random.normal(k_x, (batch, state_dim), jnp.float32)
    u = jax.random.normal(k_u, (batch, action_dim), jnp.float32)
    params = init_params(k_p, state_dim, action_dim)
    packed = pack_params(params, state_dim, action_dim)

    # Run both branches of the module (args.layer_norm False / True).
    for ln_flag in (False, True):
        out = critic_forward(x, u, packed, layer_norm=ln_flag)
        out = jax.block_until_ready(out)
        ref = _reference(x, u, params, ln_flag)
        assert out.shape == (batch, 1)
        # bf16 MXU operands (f32 accumulation) -> slightly looser tolerance.
        assert jnp.allclose(out, ref, atol=3e-2, rtol=3e-2), (out, ref)

    print("KERNEL_OK")
</pallas_src>

<mosaic_0001>
module attributes {stable_mosaic.version = 11 : i64} {
  func.func @_critic_kernel(%arg0: i32, %arg1: memref<8x16xf32, #tpu.memory_space<vmem>>, %arg2: memref<8x8xf32, #tpu.memory_space<vmem>>, %arg3: memref<16x512xbf16, #tpu.memory_space<vmem>>, %arg4: memref<8x512xbf16, #tpu.memory_space<vmem>>, %arg5: memref<1x512xf32, #tpu.memory_space<vmem>>, %arg6: memref<1x512xf32, #tpu.memory_space<vmem>>, %arg7: memref<1x512xf32, #tpu.memory_space<vmem>>, %arg8: memref<512x384xbf16, #tpu.memory_space<vmem>>, %arg9: memref<1x384xf32, #tpu.memory_space<vmem>>, %arg10: memref<1x384xf32, #tpu.memory_space<vmem>>, %arg11: memref<1x384xf32, #tpu.memory_space<vmem>>, %arg12: memref<1x384xf32, #tpu.memory_space<vmem>>, %arg13: memref<1x1xf32, #tpu.memory_space<vmem>>, %arg14: memref<8x1xf32, #tpu.memory_space<vmem>>) attributes {dimension_semantics = [#tpu.dimension_semantics<parallel>], iteration_bounds = array<i64: 1>, scalar_prefetch = 0 : i64, scratch_operands = 0 : i64, tpu.core_type = #tpu.core_type<tc>, window_params = [{transform_indices = @transform_0, window_bounds = array<i64: 8, 16>}, {transform_indices = @transform_1, window_bounds = array<i64: 8, 8>}, {pipeline_mode = #tpu.pipeline_mode<synchronous>, transform_indices = @transform_2, window_bounds = array<i64: 16, 512>}, {pipeline_mode = #tpu.pipeline_mode<synchronous>, transform_indices = @transform_3, window_bounds = array<i64: 8, 512>}, {pipeline_mode = #tpu.pipeline_mode<synchronous>, transform_indices = @transform_4, window_bounds = array<i64: 1, 512>}, {pipeline_mode = #tpu.pipeline_mode<synchronous>, transform_indices = @transform_5, window_bounds = array<i64: 1, 512>}, {pipeline_mode = #tpu.pipeline_mode<synchronous>, transform_indices = @transform_6, window_bounds = array<i64: 1, 512>}, {pipeline_mode = #tpu.pipeline_mode<synchronous>, transform_indices = @transform_7, window_bounds = array<i64: 512, 384>}, {pipeline_mode = #tpu.pipeline_mode<synchronous>, transform_indices = @transform_8, window_bounds = array<i64: 1, 384>}, {pipeline_mode = #tpu.pipeline_mode<synchronous>, transform_indices = @transform_9, window_bounds = array<i64: 1, 384>}, {pipeline_mode = #tpu.pipeline_mode<synchronous>, transform_indices = @transform_10, window_bounds = array<i64: 1, 384>}, {pipeline_mode = #tpu.pipeline_mode<synchronous>, transform_indices = @transform_11, window_bounds = array<i64: 1, 384>}, {pipeline_mode = #tpu.pipeline_mode<synchronous>, transform_indices = @transform_12, window_bounds = array<i64: 1, 1>}, {transform_indices = @transform_13, window_bounds = array<i64: 8, 1>}]} {
    %c0 = arith.constant 0 : index
    %c0_0 = arith.constant 0 : index
    %0 = vector.load %arg1[%c0, %c0_0] : memref<8x16xf32, #tpu.memory_space<vmem>>, vector<8x16xf32>
    %1 = arith.truncf %0 : vector<8x16xf32> to vector<8x16xbf16>
    %c0_1 = arith.constant 0 : index
    %c0_2 = arith.constant 0 : index
    %2 = vector.load %arg3[%c0_1, %c0_2] : memref<16x512xbf16, #tpu.memory_space<vmem>>, vector<16x512xbf16>
    %cst = arith.constant dense<0.000000e+00> : vector<8x512xf32>
    %3 = tpu.matmul %1, %2, %cst {dimension_numbers = #tpu.dot_dimension_numbers<[1], [0], [0], [1], [0, 0, 1, 1], [], []>} : vector<8x16xbf16>, vector<16x512xbf16>, vector<8x512xf32> -> vector<8x512xf32>
    %c0_3 = arith.constant 0 : index
    %c0_4 = arith.constant 0 : index
    %4 = vector.load %arg2[%c0_3, %c0_4] : memref<8x8xf32, #tpu.memory_space<vmem>>, vector<8x8xf32>
    %5 = arith.truncf %4 : vector<8x8xf32> to vector<8x8xbf16>
    %c0_5 = arith.constant 0 : index
    %c0_6 = arith.constant 0 : index
    %6 = vector.load %arg4[%c0_5, %c0_6] : memref<8x512xbf16, #tpu.memory_space<vmem>>, vector<8x512xbf16>
    %cst_7 = arith.constant dense<0.000000e+00> : vector<8x512xf32>
    %7 = tpu.matmul %5, %6, %cst_7 {dimension_numbers = #tpu.dot_dimension_numbers<[1], [0], [0], [1], [0, 0, 1, 1], [], []>} : vector<8x8xbf16>, vector<8x512xbf16>, vector<8x512xf32> -> vector<8x512xf32>
    %8 = arith.addf %3, %7 : vector<8x512xf32>
    %c0_8 = arith.constant 0 : index
    %c0_9 = arith.constant 0 : index
    %9 = vector.load %arg5[%c0_8, %c0_9] : memref<1x512xf32, #tpu.memory_space<vmem>>, vector<1x512xf32>
    %10 = vector.broadcast %9 : vector<1x512xf32> to vector<8x512xf32>
    %11 = arith.addf %8, %10 : vector<8x512xf32>
    %cst_10 = arith.constant 0.000000e+00 : f32
    %12 = vector.broadcast %cst_10 : f32 to vector<8x512xf32>
    %13 = arith.cmpf ogt, %11, %12 : vector<8x512xf32>
    %cst_11 = arith.constant 0.00999999977 : f32
    %14 = vector.broadcast %cst_11 : f32 to vector<8x512xf32>
    %15 = arith.mulf %14, %11 : vector<8x512xf32>
    %16 = arith.select %13, %11, %15 : vector<8x512xi1>, vector<8x512xf32>
    %17 = arith.truncf %16 : vector<8x512xf32> to vector<8x512xbf16>
    %c0_12 = arith.constant 0 : index
    %c0_13 = arith.constant 0 : index
    %18 = vector.load %arg8[%c0_12, %c0_13] : memref<512x384xbf16, #tpu.memory_space<vmem>>, vector<512x384xbf16>
    %cst_14 = arith.constant dense<0.000000e+00> : vector<8x384xf32>
    %19 = tpu.matmul %17, %18, %cst_14 {dimension_numbers = #tpu.dot_dimension_numbers<[1], [0], [0], [1], [0, 0, 1, 1], [], []>} : vector<8x512xbf16>, vector<512x384xbf16>, vector<8x384xf32> -> vector<8x384xf32>
    %c0_15 = arith.constant 0 : index
    %c0_16 = arith.constant 0 : index
    %20 = vector.load %arg9[%c0_15, %c0_16] : memref<1x384xf32, #tpu.memory_space<vmem>>, vector<1x384xf32>
    %21 = vector.broadcast %20 : vector<1x384xf32> to vector<8x384xf32>
    %22 = arith.addf %19, %21 : vector<8x384xf32>
    %cst_17 = arith.constant 0.000000e+00 : f32
    %23 = vector.broadcast %cst_17 : f32 to vector<8x384xf32>
    %24 = arith.cmpf ogt, %22, %23 : vector<8x384xf32>
    %cst_18 = arith.constant 0.00999999977 : f32
    %25 = vector.broadcast %cst_18 : f32 to vector<8x384xf32>
    %26 = arith.mulf %25, %22 : vector<8x384xf32>
    %27 = arith.select %24, %22, %26 : vector<8x384xi1>, vector<8x384xf32>
    %c0_19 = arith.constant 0 : index
    %c0_20 = arith.constant 0 : index
    %28 = vector.load %arg12[%c0_19, %c0_20] : memref<1x384xf32, #tpu.memory_space<vmem>>, vector<1x384xf32>
    %29 = vector.broadcast %28 : vector<1x384xf32> to vector<8x384xf32>
    %30 = arith.mulf %27, %29 : vector<8x384xf32>
    %cst_21 = arith.constant dense<0.000000e+00> : vector<8xf32>
    %31 = vector.multi_reduction <add>, %30, %cst_21 [1] : vector<8x384xf32> to vector<8xf32>
    %32 = vector.shape_cast %31 : vector<8xf32> to vector<8x1xf32>
    %c0_22 = arith.constant 0 : index
    %c0_23 = arith.constant 0 : index
    %33 = vector.load %arg13[%c0_22, %c0_23] : memref<1x1xf32, #tpu.memory_space<vmem>>, vector<1x1xf32>
    %34 = vector.broadcast %33 : vector<1x1xf32> to vector<8x1xf32>
    %35 = arith.addf %32, %34 : vector<8x1xf32>
    %c0_24 = arith.constant 0 : index
    %c0_25 = arith.constant 0 : index
    %36 = vector.load %arg14[%c0_24, %c0_25] : memref<8x1xf32, #tpu.memory_space<vmem>>, vector<8x1xf32>
    tpu.vector_store %arg14[%c0_24, %c0_25], %35 {strides = array<i32>} : memref<8x1xf32, #tpu.memory_space<vmem>>, vector<8x1xf32>,
    return
  }
  func.func @transform_0(%arg0: i32) -> (i32, i32) {
    %c0_i32 = arith.constant 0 : i32
    %c0_i32_0 = arith.constant 0 : i32
    return %arg0, %c0_i32 : i32, i32
  }
  func.func @transform_1(%arg0: i32) -> (i32, i32) {
    %c0_i32 = arith.constant 0 : i32
    %c0_i32_0 = arith.constant 0 : i32
    return %arg0, %c0_i32 : i32, i32
  }
  func.func @transform_2(%arg0: i32) -> (i32, i32) {
    %c0_i32 = arith.constant 0 : i32
    %c0_i32_0 = arith.constant 0 : i32
    %c0_i32_1 = arith.constant 0 : i32
    return %c0_i32, %c0_i32_0 : i32, i32
  }
  func.func @transform_3(%arg0: i32) -> (i32, i32) {
    %c0_i32 = arith.constant 0 : i32
    %c0_i32_0 = arith.constant 0 : i32
    %c0_i32_1 = arith.constant 0 : i32
    return %c0_i32, %c0_i32_0 : i32, i32
  }
  func.func @transform_4(%arg0: i32) -> (i32, i32) {
    %c0_i32 = arith.constant 0 : i32
    %c0_i32_0 = arith.constant 0 : i32
    %c0_i32_1 = arith.constant 0 : i32
    return %c0_i32, %c0_i32_0 : i32, i32
  }
  func.func @transform_5(%arg0: i32) -> (i32, i32) {
    %c0_i32 = arith.constant 0 : i32
    %c0_i32_0 = arith.constant 0 : i32
    %c0_i32_1 = arith.constant 0 : i32
    return %c0_i32, %c0_i32_0 : i32, i32
  }
  func.func @transform_6(%arg0: i32) -> (i32, i32) {
    %c0_i32 = arith.constant 0 : i32
    %c0_i32_0 = arith.constant 0 : i32
    %c0_i32_1 = arith.constant 0 : i32
    return %c0_i32, %c0_i32_0 : i32, i32
  }
  func.func @transform_7(%arg0: i32) -> (i32, i32) {
    %c0_i32 = arith.constant 0 : i32
    %c0_i32_0 = arith.constant 0 : i32
    %c0_i32_1 = arith.constant 0 : i32
    return %c0_i32, %c0_i32_0 : i32, i32
  }
  func.func @transform_8(%arg0: i32) -> (i32, i32) {
    %c0_i32 = arith.constant 0 : i32
    %c0_i32_0 = arith.constant 0 : i32
    %c0_i32_1 = arith.constant 0 : i32
    return %c0_i32, %c0_i32_0 : i32, i32
  }
  func.func @transform_9(%arg0: i32) -> (i32, i32) {
    %c0_i32 = arith.constant 0 : i32
    %c0_i32_0 = arith.constant 0 : i32
    %c0_i32_1 = arith.constant 0 : i32
    return %c0_i32, %c0_i32_0 : i32, i32
  }
  func.func @transform_10(%arg0: i32) -> (i32, i32) {
    %c0_i32 = arith.constant 0 : i32
    %c0_i32_0 = arith.constant 0 : i32
    %c0_i32_1 = arith.constant 0 : i32
    return %c0_i32, %c0_i32_0 : i32, i32
  }
  func.func @transform_11(%arg0: i32) -> (i32, i32) {
    %c0_i32 = arith.constant 0 : i32
    %c0_i32_0 = arith.constant 0 : i32
    %c0_i32_1 = arith.constant 0 : i32
    return %c0_i32, %c0_i32_0 : i32, i32
  }
  func.func @transform_12(%arg0: i32) -> (i32, i32) {
    %c0_i32 = arith.constant 0 : i32
    %c0_i32_0 = arith.constant 0 : i32
    %c0_i32_1 = arith.constant 0 : i32
    return %c0_i32, %c0_i32_0 : i32, i32
  }
  func.func @transform_13(%arg0: i32) -> (i32, i32) {
    %c0_i32 = arith.constant 0 : i32
    %c0_i32_0 = arith.constant 0 : i32
    return %arg0, %c0_i32 : i32, i32
  }
}

</mosaic_0001>

<bundles_post_ra>
// kernel: tpu_custom_call.1
= control target key start
LH: loop header
LB: loop body
LE: loop exit
PB: predicated region body
PF: predicated region fallthrough
CT: control target
= control target key end

     0   :  { %s1866_s0 = inlined_call_operand.hbm [shape: f32[8,16], index: 0, kind: input, shape index: {}]   ;;  %s1867_s1 = inlined_call_operand.hbm [shape: f32[8,8], index: 1, kind: input, shape index: {}]   ;;  %s1868_s2 = inlined_call_operand.hbm [shape: bf16[16,512], index: 2, kind: input, shape index: {}]   ;;  %s1869_s3 = inlined_call_operand.hbm [shape: bf16[8,512], index: 3, kind: input, shape index: {}]   ;;  %s1870_s4 = inlined_call_operand.vmem [shape: f32[1,512], index: 4, kind: input, shape index: {}]   ;;  %s1871_s5 = inlined_call_operand.vmem [shape: f32[1,512], index: 5, kind: input, shape index: {}]   ;;  %s1872_s6 = inlined_call_operand.vmem [shape: f32[1,512], index: 6, kind: input, shape index: {}]   ;;  %s1873_s7 = inlined_call_operand.hbm [shape: bf16[512,384], index: 7, kind: input, shape index: {}]   ;;  %s1874_s8 = inlined_call_operand.vmem [shape: f32[1,384], index: 8, kind: input, shape index: {}]   ;;  %s1875_s9 = inlined_call_operand.vmem [shape: f32[1,384], index: 9, kind: input, shape index: {}]   ;;  %s1876_s10 = inlined_call_operand.vmem [shape: f32[1,384], index: 10, kind: input, shape index: {}]   ;;  %s1877_s11 = inlined_call_operand.vmem [shape: f32[1,384], index: 11, kind: input, shape index: {}]   ;;  %s1878_s12 = inlined_call_operand.<no memory space> [shape: f32[1,1], index: 12, kind: input, shape index: {}]   ;;  %s1879_s13 = inlined_call_operand.vmem [shape: f32[8,1], index: 13, kind: output, shape index: {}]  }
   0x1   :  { %v18_v0 = vstv %s1878_s12 }
   0x2   :  { %19 = vst [vmem:[#allocation2] sm:$0x1] %v18_v0 }
   0x3   :  { %20 = vsyncpa [#allocation4], 0 }
   0x4   :  { %21 = vsyncpa [#allocation6], 0 }
   0x5   :  { %22 = vsyncpa [#allocation9], 0  ;;  %s1670_s9 = smov [#allocation5]   ;;  %s1671_s10 = smov [#allocation8]  }
   0x6   :  { %s39_s25 = sshll.u32 %s1670_s9, 4  ;;  %s61_s26 = sshll.u32 %s1671_s10, 4  ;;  %s40_s25 = int_to_ptr.vmem [resolvable:$true] %s39_s25  ;;  %s62_s26 = int_to_ptr.vmem [resolvable:$true] %s61_s26 }
   0x7   :  { %s1554_s29 = scalar_lea.hbm %s1867_s1, 128 }
   0x8   :  { %p1555_p0 = scmp.ne.s32.totalorder %s1867_s1, %s1554_s29  ;;  %p1558_p1 = scmp.lt.u32.totalorder %s1554_s29, %s1867_s1 }
   0xa   :  { %p1560_p2 = pnand %p1558_p1, %p1555_p0 }
   0xc   :  { %1563 = shalt.err (!%p1560_p2)
}
   0xd   :  { %s1564_s16 = scalar_lea.vmem %s40_s25, 128  ;;  %p1569_p4 = scmp.lt.s32.totalorder %s40_s25, %s40_s25 }
   0xe   :  { %p1565_p3 = scmp.ne.s32.totalorder %s40_s25, %s1564_s16  ;;  %p1570_p5 = scmp.lt.s32.totalorder %s1564_s16, %s1564_s16 }
  0x10   :  { %p1571_p6 = por %p1570_p5, %p1569_p4 }
  0x12   :  { %p1572_p7 = pnand %p1571_p6, %p1565_p3 }
  0x14   :  { %1575 = shalt.err (!%p1572_p7)
}
  0x15   :  { %42 = dma.hbm_to_vmem [thread:$0]  %s1867_s1, 128, %s40_s25, [#allocation6]  }
  0x16   :  { %s1576_s21 = scalar_lea.hbm %s1869_s3, 256 }
  0x17   :  { %p1577_p8 = scmp.ne.s32.totalorder %s1869_s3, %s1576_s21  ;;  %p1580_p9 = scmp.lt.u32.totalorder %s1576_s21, %s1869_s3 }
  0x19   :  { %p1582_p10 = pnand %p1580_p9, %p1577_p8 }
  0x1b   :  { %1585 = shalt.err (!%p1582_p10)
}
  0x1c   :  { %s1586_s24 = scalar_lea.vmem %s62_s26, 256  ;;  %p1591_p12 = scmp.lt.s32.totalorder %s62_s26, %s62_s26 }
  0x1d   :  { %p1587_p11 = scmp.ne.s32.totalorder %s62_s26, %s1586_s24  ;;  %p1592_p13 = scmp.lt.s32.totalorder %s1586_s24, %s1586_s24 }
  0x1f   :  { %p1593_p0 = por %p1592_p13, %p1591_p12 }
  0x21   :  { %p1594_p1 = pnand %p1593_p0, %p1587_p11 }
  0x23   :  { %1597 = shalt.err (!%p1594_p1)
}
  0x24   :  { %64 = dma.hbm_to_vmem [thread:$0]  %s1869_s3, 256, %s62_s26, [#allocation9]  }
  0x25   :  { %s1672_s25 = smov [#allocation3]   ;;  %s1673_s27 = smov [#allocation7]  }
  0x26   :  { %s29_s10 = sshll.u32 %s1672_s25, 4  ;;  %s48_s28 = sshll.u32 %s1673_s27, 4  ;;  %s30_s10 = int_to_ptr.vmem [resolvable:$true] %s29_s10  ;;  %s1777_s28 = int_to_ptr.vmem [resolvable:$true] %s48_s28 }
  0x27   :  { %s1598_s14 = scalar_lea.hbm %s1866_s0, 128 }
  0x28   :  { %p1599_p2 = scmp.ne.s32.totalorder %s1866_s0, %s1598_s14  ;;  %p1602_p3 = scmp.lt.u32.totalorder %s1598_s14, %s1866_s0 }
  0x2a   :  { %p1604_p4 = pnand %p1602_p3, %p1599_p2 }
  0x2c   :  { %1607 = shalt.err (!%p1604_p4)
}
  0x2d   :  { %s1608_s3 = scalar_lea.vmem %s30_s10, 128  ;;  %p1613_p6 = scmp.lt.s32.totalorder %s30_s10, %s30_s10 }
  0x2e   :  { %p1609_p5 = scmp.ne.s32.totalorder %s30_s10, %s1608_s3  ;;  %p1614_p7 = scmp.lt.s32.totalorder %s1608_s3, %s1608_s3 }
  0x30   :  { %p1615_p8 = por %p1614_p7, %p1613_p6 }
  0x32   :  { %p1616_p9 = pnand %p1615_p8, %p1609_p5 }
  0x34   :  { %1619 = shalt.err (!%p1616_p9)
}
  0x35   :  { %32 = dma.hbm_to_vmem [thread:$0]  %s1866_s0, 128, %s30_s10, [#allocation4]  }
  0x36   :  { %s1620_s21 = scalar_lea.hbm %s1868_s2, 512 }
  0x37   :  { %p1621_p10 = scmp.ne.s32.totalorder %s1868_s2, %s1620_s21  ;;  %p1624_p11 = scmp.lt.u32.totalorder %s1620_s21, %s1868_s2 }
  0x39   :  { %p1626_p12 = pnand %p1624_p11, %p1621_p10 }
  0x3b   :  { %1629 = shalt.err (!%p1626_p12)
}
  0x3c   :  { %s1630_s24 = scalar_lea.vmem %s1777_s28, 512  ;;  %p1635_p0 = scmp.lt.s32.totalorder %s1777_s28, %s1777_s28 }
  0x3d   :  { %p1631_p13 = scmp.ne.s32.totalorder %s1777_s28, %s1630_s24  ;;  %p1636_p1 = scmp.lt.s32.totalorder %s1630_s24, %s1630_s24 }
  0x3f   :  { %p1637_p2 = por %p1636_p1, %p1635_p0 }
  0x41   :  { %p1638_p3 = pnand %p1637_p2, %p1631_p13 }
  0x43   :  { %1641 = shalt.err (!%p1638_p3)
}
  0x44   :  { %s1674_s0 = smov 256   ;;  %s1675_s1 = smov 16  }
  0x45   :  { %54 = dma.hbm_to_vmem [thread:$0]  %s1868_s2, 512, %s1777_s28, [#allocation6], %s1674_s0, %s1674_s0, %s1675_s1  }
  0x46   :  { %s1676_s10 = smov [#allocation10]   ;;  %s1642_s14 = scalar_lea.hbm %s1873_s7, 12288 }
  0x47   :  { %s76_s27 = sshll.u32 %s1676_s10, 4  ;;  %p1643_p4 = scmp.ne.s32.totalorder %s1873_s7, %s1642_s14  ;;  %s77_s27 = int_to_ptr.vmem [resolvable:$true] %s76_s27 }
  0x48   :  { %p1646_p5 = scmp.lt.u32.totalorder %s1642_s14, %s1873_s7 }
  0x4a   :  { %p1648_p6 = pnand %p1646_p5, %p1643_p4 }
  0x4c   :  { %1651 = shalt.err (!%p1648_p6)
}
  0x4d   :  { %s1652_s3 = scalar_lea.vmem %s77_s27, 12288  ;;  %p1657_p8 = scmp.lt.s32.totalorder %s77_s27, %s77_s27 }
  0x4e   :  { %p1653_p7 = scmp.ne.s32.totalorder %s77_s27, %s1652_s3  ;;  %p1658_p9 = scmp.lt.s32.totalorder %s1652_s3, %s1652_s3 }
  0x50   :  { %p1659_p10 = por %p1658_p9, %p1657_p8 }
  0x52   :  { %p1660_p11 = pnand %p1659_p10, %p1653_p7 }
  0x54   :  { %1663 = shalt.err (!%p1660_p11)
}
  0x55   :  { %s1677_s2 = smov 192   ;;  %s1678_s28 = smov 12  }
  0x56   :  { %82 = dma.hbm_to_vmem [thread:$0]  %s1873_s7, 12288, %s77_s27, [#allocation9], %s1677_s2, %s1677_s2, %s1678_s28  }
  0x57   :  { %1664 = dma.done.wait [#allocation4], 128  }
  0x58   :  { %1665 = vsyncadd [#allocation4], 4294967168 }
  0x59   :  { %1666 = dma.done.wait [#allocation6], 640  }
  0x5a   :  { %1667 = vsyncadd [#allocation6], 4294966656 }
  0x5b   :  { %1668 = dma.done.wait [#allocation9], 12544  }
  0x5c   :  { %1669 = vsyncadd [#allocation9], 4294954752  ;;  %v1679_v1 = vmov 0   ;;  %v117_v2 = vld [vmem:[#allocation8] sm:$0xff]  ;;  %vm133_vm0 = vcmask 1043456   ;;  %v115_v3 = vld [vmem:[#allocation5] sm:$0xff] }
  0x5d   :  { %178 = vmatprep.mubr.bf16.mxu1 %v1679_v1  ;;  %v118_v4 = vld [vmem:[#allocation8 + $0x8] sm:$0xff]  ;;  %v1246_v5 = vcombine.high %v117_v2, %v117_v2  ;;  %v1245_v6 = vcombine.low %v117_v2, %v117_v2  ;;  %v116_v10 = vpack.c.bf16 %v115_v3, %v115_v3  ;;  %v1422_v11 = vld [vmem:[#allocation7 + $0x4] ss:$16 sps:$4 sm:$0xff]   ;;  %vm129_vm1 = vcmask 64512   ;;  %v1428_v14 = vld [vmem:[#allocation10] ss:$12 sps:$4 sm:$0xff]  }
  0x5e   :  { %v1248_v7 = vcombine.high %v118_v4, %v118_v4  ;;  %v1247_v8 = vcombine.low %v118_v4, %v118_v4  ;;  %v1426_v12 = vld [vmem:[#allocation10 + $0x4] ss:$12 sps:$4 sm:$0xff]   ;;  %v1429_v15 = vld [vmem:[#allocation10 + $0x1c] ss:$12 sps:$4 sm:$0xff]   ;;  %v1432_v17 = vld [vmem:[#allocation10 + $0x34] ss:$12 sps:$4 sm:$0xff]  }
  0x5f   :  { %1249 = vmatprep.subr.msk.bf16.mxu1 %vm133_vm0, %v1246_v5  ;;  %v135_v9 = vsel %vm133_vm0, %v1245_v6, 0  ;;  %1033 = vmatprep.subr.bf16.mxu0 %v1426_v12  ;;  %v1431_v16 = vld [vmem:[#allocation10 + $0x18] ss:$12 sps:$4 sm:$0xff]   ;;  %v1420_v18 = vld [vmem:[#allocation7] ss:$16 sps:$4 sm:$0xff]   ;;  %vm248_vm2 = vcmask 130048  }
  0x60   :  { %147 = vmatpush1.bf16.msra.mxu1 %v135_v9  ;;  %v141_v13 = vsel %vm133_vm0, %v1247_v8, 0  ;;  %1034 = vmatpush1.bf16.msra.mxu0 %v1428_v14  ;;  %v1434_v19 = vld [vmem:[#allocation10 + $0x30] ss:$12 sps:$4 sm:$0xff]   ;;  %v1435_v21 = vld [vmem:[#allocation10 + $0x4c] ss:$12 sps:$4 sm:$0xff]   ;;  %v109_v23 = vld [vmem:[#allocation3] sm:$0xff]  ;;  %v336_v8 = vlaneseq }
  0x61   :  { %1251 = vmatprep.subr.msk.bf16.mxu1 %vm133_vm0, %v1248_v7  ;;  %1035 = vmatprep.subr.bf16.mxu0 %v1429_v15  ;;  %v1425_v20 = vld [vmem:[#allocation7 + $0xc] ss:$16 sps:$4 sm:$0xff]   ;;  %v1437_v22 = vld [vmem:[#allocation10 + $0x48] ss:$12 sps:$4 sm:$0xff]   ;;  %v1438_v24 = vld [vmem:[#allocation10 + $0x64] ss:$12 sps:$4 sm:$0xff]   ;;  %v110_v27 = vpack.c.bf16 %v109_v23, %v109_v23 }
  0x62   :  { %v1423_v25 = vld [vmem:[#allocation7 + $0x8] ss:$16 sps:$4 sm:$0xff]   ;;  %v1440_v26 = vld [vmem:[#allocation10 + $0x60] ss:$12 sps:$4 sm:$0xff]   ;;  %v1446_v32 = vld [vmem:[#allocation10 + $0x90] ss:$12 sps:$4 sm:$0xff]  }
  0x63   :  { %1250 = vmatmul.mubr.msk.bf16.vlgmr.msra.gmra.mrb[0].mxu1 %vm129_vm1, %v116_v10  ;;  %v1441_v28 = vld [vmem:[#allocation10 + $0x7c] ss:$12 sps:$4 sm:$0xff]   ;;  %v1443_v30 = vld [vmem:[#allocation10 + $0x78] ss:$12 sps:$4 sm:$0xff]   ;;  %v1444_v31 = vld [vmem:[#allocation10 + $0x94] ss:$12 sps:$4 sm:$0xff]  }
  0x64   :  { %188 = vmatpush1.bf16.msra.mxu1 %v141_v13  ;;  %219 = vmatprep.mubr.bf16.mxu1 %v1679_v1  ;;  %v1452_v29 = vld [vmem:[#allocation10 + $0xc8] ss:$12 sps:$4 sm:$0xff]   ;;  %v1447_v33 = vld [vmem:[#allocation10 + $0xac] ss:$12 sps:$4 sm:$0xff]   ;;  %v1450_v37 = vld [vmem:[#allocation10 + $0xc4] ss:$12 sps:$4 sm:$0xff]  }
  0x65   :  { %252 = vmatprep.subr.bf16.mxu1 %v1422_v11  ;;  %1036 = vmatpush1.bf16.msra.mxu0 %v1431_v16  ;;  %v1454_v34 = vld [vmem:[#allocation10 + $0x8] ss:$12 sps:$4 sm:$0xff]   ;;  %v1457_v35 = vld [vmem:[#allocation10 + $0xe0] ss:$12 sps:$4 sm:$0xff]   ;;  %v1458_v40 = vld [vmem:[#allocation10 + $0xd8] ss:$12 sps:$4 sm:$0xff]  }
  0x66   :  { %1037 = vmatprep.subr.bf16.mxu0 %v1432_v17  ;;  %v1449_v36 = vld [vmem:[#allocation10 + $0xa8] ss:$12 sps:$4 sm:$0xff]   ;;  %v1453_v38 = vld [vmem:[#allocation10 + $0xc0] ss:$12 sps:$4 sm:$0xff]   ;;  %v1462_v43 = vld [vmem:[#allocation10 + $0xf8] ss:$12 sps:$4 sm:$0xff]  }
  0x67   :  { %v1455_v39 = vld [vmem:[#allocation10 + $0xdc] ss:$12 sps:$4 sm:$0xff]   ;;  %v1459_v41 = vld [vmem:[#allocation10 + $0x20] ss:$12 sps:$4 sm:$0xff]   ;;  %v1464_v45 = vld [vmem:[#allocation10 + $0x38] ss:$12 sps:$4 sm:$0xff]  }
  0x68   :  { %v1460_v42 = vld [vmem:[#allocation10 + $0xf4] ss:$12 sps:$4 sm:$0xff]   ;;  %v1463_v44 = vld [vmem:[#allocation10 + $0xf0] ss:$12 sps:$4 sm:$0xff]   ;;  %v1465_v46 = vld [vmem:[#allocation10 + $0x10c] ss:$12 sps:$4 sm:$0xff]  }
  0x69   :  { %1038 = vmatpush1.bf16.msra.mxu0 %v1434_v19  ;;  %v1467_v47 = vld [vmem:[#allocation10 + $0x110] ss:$12 sps:$4 sm:$0xff]   ;;  %v1468_v48 = vld [vmem:[#allocation10 + $0x108] ss:$12 sps:$4 sm:$0xff]   ;;  %v1473_v52 = vld [vmem:[#allocation10 + $0x120] ss:$12 sps:$4 sm:$0xff]  }
  0x6a   :  { %1039 = vmatprep.subr.bf16.mxu0 %v1435_v21  ;;  %v1469_v49 = vld [vmem:[#allocation10 + $0x50] ss:$12 sps:$4 sm:$0xff]   ;;  %v1472_v51 = vld [vmem:[#allocation10 + $0x128] ss:$12 sps:$4 sm:$0xff]   ;;  %v1477_v55 = vld [vmem:[#allocation10 + $0x140] ss:$12 sps:$4 sm:$0xff]  }
  0x6b   :  { %1252 = vmatmul.mubr.msk.bf16.vlgmr.msra.gmra.mrb[4].mxu1 %vm129_vm1, %v116_v10  ;;  %v1470_v50 = vld [vmem:[#allocation10 + $0x124] ss:$12 sps:$4 sm:$0xff]   ;;  %v1474_v53 = vld [vmem:[#allocation10 + $0x68] ss:$12 sps:$4 sm:$0xff]   ;;  %v1479_v57 = vld [vmem:[#allocation10 + $0x80] ss:$12 sps:$4 sm:$0xff]  }
  0x6c   :  { %253 = vmatpush1.bf16.msra.mxu1 %v1420_v18  ;;  %284 = vmatprep.mubr.bf16.mxu1 %v1679_v1  ;;  %v1475_v54 = vld [vmem:[#allocation10 + $0x13c] ss:$12 sps:$4 sm:$0xff]   ;;  %v1478_v56 = vld [vmem:[#allocation10 + $0x138] ss:$12 sps:$4 sm:$0xff]   ;;  %v1480_v58 = vld [vmem:[#allocation10 + $0x154] ss:$12 sps:$4 sm:$0xff]  }
  0x6d   :  { %293 = vmatprep.subr.bf16.mxu1 %v1425_v20  ;;  %1040 = vmatpush1.bf16.msra.mxu0 %v1437_v22  ;;  %v1482_v59 = vld [vmem:[#allocation10 + $0x158] ss:$12 sps:$4 sm:$0xff]   ;;  %v1483_v60 = vld [vmem:[#allocation10 + $0x150] ss:$12 sps:$4 sm:$0xff]   ;;  %v1488_v0 = vld [vmem:[#allocation10 + $0x168] ss:$12 sps:$4 sm:$0xff]  }
  0x6e   :  { %1041 = vmatprep.subr.bf16.mxu0 %v1438_v24  ;;  %v1484_v61 = vld [vmem:[#allocation10 + $0x98] ss:$12 sps:$4 sm:$0xff]   ;;  %v1487_v63 = vld [vmem:[#allocation10 + $0x170] ss:$12 sps:$4 sm:$0xff]   ;;  %v1493_v3 = vld [vmem:[#allocation10 + $0x248] ss:$12 sps:$4 sm:$0xff]  }
  0x6f   :  { %v1485_v62 = vld [vmem:[#allocation10 + $0x16c] ss:$12 sps:$4 sm:$0xff]   ;;  %v1492_v2 = vld [vmem:[#allocation10 + $0x184] ss:$12 sps:$4 sm:$0xff]   ;;  %v1824_v9 = vshrl.u32 %v336_v8, 7  ;;  %vm1236_vm10 = vcmask 7168  }
  0x70   :  { %v1832_v15 = vld [vmem:[%s1870_s4] sm:$0xf] }
  0x71   :  { %1042 = vmatpush1.bf16.msra.mxu0 %v1440_v26  ;;  %v1827_v14 = vsub.s32 0, %v1824_v9  ;;  %v1835_v16 = vsub.s32 1, %v1824_v9  ;;  %v1520_v8 = vld [vmem:[#allocation10 + $0x210] ss:$12 sps:$4 sm:$0xff]  }
  0x72   :  { %1043 = vmatprep.subr.bf16.mxu0 %v1441_v28 }
  0x73   :  { %1257 = vmatmul.mubr.msk.bf16.vlgmr.msra.gmra.mrb[8].mxu1 %vm248_vm2, %v110_v27  ;;  %v339_v17 = vrot.slane %v1832_v15, %v1827_v14  ;;  %v343_v19 = vrot.slane %v1832_v15, %v1835_v16 }
  0x74   :  { %294 = vmatpush1.bf16.msra.mxu1 %v1423_v25  ;;  %325 = vmatprep.mubr.bf16.mxu1 %v1679_v1  ;;  %v1489_v1 = vld [vmem:[#allocation10 + $0xb0] ss:$12 sps:$4 sm:$0xff]  }
  0x75   :  { %1356 = vmatprep.subr.bf16.mxu1 %v1452_v29  ;;  %1044 = vmatpush1.bf16.msra.mxu0 %v1443_v30 }
  0x76   :  { %1045 = vmatprep.subr.bf16.mxu0 %v1444_v31 }
  0x79   :  { %1046 = vmatpush1.bf16.msra.mxu0 %v1446_v32 }
  0x7a   :  { %1047 = vmatprep.subr.bf16.mxu0 %v1447_v33 }
  0x7b   :  { %1258 = vmatmul.mubr.msk.bf16.vlgmr.msra.gmra.mrb[12].mxu1 %vm248_vm2, %v110_v27  ;;  %v350_v27 = vsub.s32 3, %v1824_v9 }
  0x7c   :  { %1357 = vmatpush3.bf16.msra.mxu1 %v1454_v34 }
  0x7d   :  { %1358 = vmatprep.subr.bf16.mxu1 %v1457_v35  ;;  %1048 = vmatpush1.bf16.msra.mxu0 %v1449_v36  ;;  %v351_v32 = vrot.slane %v1832_v15, %v350_v27  ;;  %v1544_v27 = vld [vmem:[#allocation10 + $0x2a4] ss:$12 sps:$4 sm:$0xff]  }
  0x7e   :  { %1049 = vmatprep.subr.bf16.mxu0 %v1450_v37  ;;  %v1490_v37 = vld [vmem:[#allocation10 + $0x180] ss:$12 sps:$4 sm:$0xff]  }
  0x80   :  { %1359 = vmatpush3.bf16.msra.mxu1 %v1459_v41  ;;  %v1497_v41 = vld [vmem:[#allocation10 + $0x19c] ss:$12 sps:$4 sm:$0xff]  }
  0x81   :  { %1050 = vmatpush1.bf16.msra.mxu0 %v1453_v38  ;;  %1360 = vmatprep.subr.bf16.mxu1 %v1462_v43  ;;  %v1494_v38 = vld [vmem:[#allocation10 + $0x188] ss:$12 sps:$4 sm:$0xff]  }
  0x82   :  { %1051 = vmatprep.subr.bf16.mxu0 %v1455_v39 }
  0x84   :  { %1361 = vmatpush3.bf16.msra.mxu1 %v1464_v45 }
  0x85   :  { %1052 = vmatpush1.bf16.msra.mxu0 %v1458_v40  ;;  %1362 = vmatprep.subr.bf16.mxu1 %v1467_v47  ;;  %v1499_v47 = vld [vmem:[#allocation10 + $0x1a0] ss:$12 sps:$4 sm:$0xff]  }
  0x86   :  { %1053 = vmatprep.subr.bf16.mxu0 %v1460_v42  ;;  %v1498_v42 = vld [vmem:[#allocation10 + $0x260] ss:$12 sps:$4 sm:$0xff]  }
  0x88   :  { %1363 = vmatpush3.bf16.msra.mxu1 %v1469_v49 }
  0x89   :  { %1054 = vmatpush1.bf16.msra.mxu0 %v1463_v44  ;;  %1364 = vmatprep.subr.bf16.mxu1 %v1472_v51 }
  0x8a   :  { %1055 = vmatprep.subr.bf16.mxu0 %v1465_v46  ;;  %v1495_v46 = vld [vmem:[#allocation10 + $0x198] ss:$12 sps:$4 sm:$0xff]  }
  0x8c   :  { %1365 = vmatpush3.bf16.msra.mxu1 %v1474_v53 }
  0x8d   :  { %1056 = vmatpush1.bf16.msra.mxu0 %v1468_v48  ;;  %1366 = vmatprep.subr.bf16.mxu1 %v1477_v55  ;;  %v1502_v48 = vld [vmem:[#allocation10 + $0x1b4] ss:$12 sps:$4 sm:$0xff]   ;;  %v1507_v55 = vld [vmem:[#allocation10 + $0x1cc] ss:$12 sps:$4 sm:$0xff]  }
  0x8e   :  { %1057 = vmatprep.subr.bf16.mxu0 %v1470_v50  ;;  %v1503_v50 = vld [vmem:[#allocation10 + $0x278] ss:$12 sps:$4 sm:$0xff]  }
  0x90   :  { %1367 = vmatpush3.bf16.msra.mxu1 %v1479_v57  ;;  %v1505_v57 = vld [vmem:[#allocation10 + $0x1c8] ss:$12 sps:$4 sm:$0xff]  }
  0x91   :  { %1058 = vmatpush1.bf16.msra.mxu0 %v1473_v52  ;;  %1368 = vmatprep.subr.bf16.mxu1 %v1482_v59  ;;  %v1500_v52 = vld [vmem:[#allocation10 + $0x1b0] ss:$12 sps:$4 sm:$0xff]  }
  0x92   :  { %1059 = vmatprep.subr.bf16.mxu0 %v1475_v54  ;;  %v1504_v54 = vld [vmem:[#allocation10 + $0x1b8] ss:$12 sps:$4 sm:$0xff]  }
  0x93   :  { %v1512_v59 = vld [vmem:[#allocation10 + $0x1e4] ss:$12 sps:$4 sm:$0xff]  }
  0x94   :  { %1369 = vmatpush3.bf16.msra.mxu1 %v1484_v61  ;;  %v1846_v61 = vsub.s32 2, %v1824_v9  ;;  %v1524_v9 = vld [vmem:[#allocation10 + $0x218] ss:$12 sps:$4 sm:$0xff]  }
  0x95   :  { %1060 = vmatpush1.bf16.msra.mxu0 %v1478_v56  ;;  %1370 = vmatprep.subr.bf16.mxu1 %v1487_v63  ;;  %v1508_v56 = vld [vmem:[#allocation10 + $0x290] ss:$12 sps:$4 sm:$0xff]   ;;  %v1514_v63 = vld [vmem:[#allocation10 + $0x1e8] ss:$12 sps:$4 sm:$0xff]  }
  0x96   :  { %1061 = vmatprep.subr.bf16.mxu0 %v1480_v58  ;;  %v1509_v58 = vld [vmem:[#allocation10 + $0x1d0] ss:$12 sps:$4 sm:$0xff]  }
  0x98   :  { %1371 = vmatpush3.bf16.msra.mxu1 %v1489_v1  ;;  %v1518_v1 = vld [vmem:[#allocation10 + $0x2c0] ss:$12 sps:$4 sm:$0xff]  }
  0x99   :  { %1062 = vmatpush1.bf16.msra.mxu0 %v1483_v60  ;;  %1378 = vmatprep.subr.bf16.mxu1 %v1493_v3  ;;  %v1513_v60 = vld [vmem:[#allocation10 + $0x2a8] ss:$12 sps:$4 sm:$0xff]   ;;  %v1515_v3 = vld [vmem:[#allocation10 + $0x1f8] ss:$12 sps:$4 sm:$0xff]  }
  0x9a   :  { %1063 = vmatprep.subr.bf16.mxu0 %v1485_v62  ;;  %v1510_v62 = vld [vmem:[#allocation10 + $0x1e0] ss:$12 sps:$4 sm:$0xff]  }
  0x9d   :  { %1064 = vmatpush1.bf16.msra.mxu0 %v1488_v0  ;;  %v1517_v0 = vld [vmem:[#allocation10 + $0x1fc] ss:$12 sps:$4 sm:$0xff]  }
  0x9e   :  { %1074 = vmatprep.subr.bf16.mxu0 %v1492_v2  ;;  %v347_v2 = vrot.slane %v1832_v15, %v1846_v61  ;;  %v1529_v15 = vld [vmem:[#allocation10 + $0x230] ss:$12 sps:$4 sm:$0xff]  }
 0x136   :  { %v180_v4 = vpop.f32.mrb[0].mxu1 }
 0x137   :  { %v182_v5 = vpop.f32.mrb[1].mxu1 }
 0x138   :  { %v184_v6 = vpop.f32.mrb[2].mxu1 }
 0x139   :  { %v185_v7 = vpop.f32.mrb[3].mxu1  ;;  %v1523_v6 = vld [vmem:[#allocation10 + $0x2d8] ss:$12 sps:$4 sm:$0xff]  }
 0x13e   :  { %v221_v10 = vpop.f32.mrb[4].mxu1 }
 0x13f   :  { %v223_v11 = vpop.f32.mrb[5].mxu1 }
 0x140   :  { %v225_v12 = vpop.f32.mrb[6].mxu1 }
 0x141   :  { %v226_v13 = vpop.f32.mrb[7].mxu1 }
 0x142   :  { %v1525_v13 = vld [vmem:[#allocation10 + $0x228] ss:$12 sps:$4 sm:$0xff]  }
 0x146   :  { %v286_v18 = vpop.f32.mrb[8].mxu1 }
 0x147   :  { %v287_v20 = vadd.f32 %v286_v18, %v180_v4  ;;  %v288_v21 = vpop.f32.mrb[9].mxu1  ;;  %v1519_v4 = vld [vmem:[#allocation10 + $0x200] ss:$12 sps:$4 sm:$0xff]  }
 0x148   :  { %v289_v22 = vadd.f32 %v288_v21, %v182_v5  ;;  %v290_v23 = vpop.f32.mrb[10].mxu1  ;;  %v1522_v5 = vld [vmem:[#allocation10 + $0x214] ss:$12 sps:$4 sm:$0xff]   ;;  %v1535_v21 = vld [vmem:[#allocation10 + $0x25c] ss:$12 sps:$4 sm:$0xff]  }
 0x149   :  { %v356_v24 = vadd.f32 %v339_v17, %v287_v20  ;;  %v291_v25 = vpop.f32.mrb[11].mxu1  ;;  %v1532_v17 = vld [vmem:[#allocation10 + $0x244] ss:$12 sps:$4 sm:$0xff]   ;;  %v1538_v23 = vld [vmem:[#allocation10 + $0x274] ss:$12 sps:$4 sm:$0xff]  }
 0x14a   :  { %v357_v26 = vadd.f32 %v343_v19, %v289_v22  ;;  %v1530_v19 = vld [vmem:[#allocation10 + $0x240] ss:$12 sps:$4 sm:$0xff]   ;;  %v1533_v22 = vld [vmem:[#allocation10 + $0x258] ss:$12 sps:$4 sm:$0xff]  }
 0x14b   :  { %v364_v28 = vmul.f32 0.01, %v356_v24  ;;  %vm360_vm3 = vcmp.gt.f32.partialorder %v356_v24, 0.0  ;;  %v1541_v25 = vld [vmem:[#allocation10 + $0x28c] ss:$12 sps:$4 sm:$0xff]  }
 0x14c   :  { %vm361_vm4 = vcmp.gt.f32.partialorder %v357_v26, 0.0  ;;  %v365_v29 = vmul.f32 0.01, %v357_v26 }
 0x14d   :  { %v368_v30 = vsel %vm360_vm3, %v356_v24, %v364_v28  ;;  %v1536_v24 = vld [vmem:[#allocation10 + $0x270] ss:$12 sps:$4 sm:$0xff]   ;;  %v1542_v28 = vld [vmem:[#allocation10 + $0x2a0] ss:$12 sps:$4 sm:$0xff]  }
 0x14e   :  { %v327_v31 = vpop.f32.mrb[12].mxu1  ;;  %v369_v33 = vsel %vm361_vm4, %v357_v26, %v365_v29  ;;  %v372_v40 = vpack.c.bf16 %v368_v30, %v368_v30  ;;  %v1539_v26 = vld [vmem:[#allocation10 + $0x288] ss:$12 sps:$4 sm:$0xff]   ;;  %v1545_v30 = vld [vmem:[#allocation10 + $0x2b8] ss:$12 sps:$4 sm:$0xff]  }
 0x14f   :  { %v1843_v34 = vadd.f32 %v327_v31, %v221_v10  ;;  %v329_v35 = vpop.f32.mrb[13].mxu1  ;;  %v373_v36 = vpack.c.bf16 %v369_v33, %v369_v33  ;;  %v1527_v10 = vld [vmem:[#allocation10 + $0x22c] ss:$12 sps:$4 sm:$0xff]   ;;  %v1547_v29 = vld [vmem:[#allocation10 + $0x2bc] ss:$12 sps:$4 sm:$0xff]  }
 0x150   :  { %v330_v39 = vadd.f32 %v329_v35, %v223_v11  ;;  %v331_v43 = vpop.f32.mrb[14].mxu1  ;;  %v1528_v11 = vld [vmem:[#allocation10 + $0x2f0] ss:$12 sps:$4 sm:$0xff]   ;;  %v1550_v31 = vld [vmem:[#allocation10 + $0x2d4] ss:$12 sps:$4 sm:$0xff]  }
 0x151   :  { %1065 = vmatprep.mubr.bf16.mxu0 %v373_v36  ;;  %1147 = vmatprep.mubr.bf16.mxu1 %v373_v36  ;;  %v332_v44 = vpop.f32.mrb[15].mxu1  ;;  %v358_v7 = vadd.f32 %v347_v2, %v1843_v34  ;;  %v1553_v33 = vld [vmem:[#allocation10 + $0x2ec] ss:$12 sps:$4 sm:$0xff]   ;;  %v1551_v34 = vld [vmem:[#allocation10 + $0x2e8] ss:$12 sps:$4 sm:$0xff]  }
 0x152   :  { %v359_v45 = vadd.f32 %v351_v32, %v330_v39  ;;  %1066 = vmatmul.mubr.bf16.vlgmr.msra.gmra.mrb[0].mxu0 %v372_v40  ;;  %1148 = vmatmul.mubr.bf16.vlgmr.msra.gmra.mrb[16].mxu1 %v372_v40  ;;  %v1548_v32 = vld [vmem:[#allocation10 + $0x2d0] ss:$12 sps:$4 sm:$0xff]  }
 0x153   :  { %1075 = vmatpush1.bf16.msra.mxu0 %v1490_v37  ;;  %1379 = vmatpush3.bf16.msra.mxu1 %v1494_v38  ;;  %v366_v12 = vmul.f32 0.01, %v358_v7  ;;  %vm362_vm6 = vcmp.gt.f32.partialorder %v358_v7, 0.0  ;;  %v504_v40 = vld [vmem:[%s1874_s8] sm:$0x7] }
 0x154   :  { %v367_v49 = vmul.f32 0.01, %v359_v45  ;;  %1076 = vmatprep.subr.bf16.mxu0 %v1497_v41  ;;  %1380 = vmatprep.subr.bf16.mxu1 %v1498_v42  ;;  %vm363_vm5 = vcmp.gt.f32.partialorder %v359_v45, 0.0  ;;  %v517_v41 = vrot.slane %v504_v40, %v1846_v61 }
 0x155   :  { %v370_v18 = vsel %vm362_vm6, %v358_v7, %v366_v12 }
 0x156   :  { %v371_v51 = vsel %vm363_vm5, %v359_v45, %v367_v49  ;;  %v374_v20 = vpack.c.bf16 %v370_v18, %v370_v18  ;;  %v509_v49 = vrot.slane %v504_v40, %v1827_v14 }
 0x157   :  { %1077 = vmatpush1.bf16.msra.mxu0 %v1495_v46  ;;  %1381 = vmatpush3.bf16.msra.mxu1 %v1499_v47  ;;  %v375_v53 = vpack.c.bf16 %v371_v51, %v371_v51 }
 0x158   :  { %1078 = vmatprep.subr.bf16.mxu0 %v1502_v48  ;;  %1382 = vmatprep.subr.bf16.mxu1 %v1503_v50  ;;  %v513_v50 = vrot.slane %v504_v40, %v1835_v16 }
 0x159   :  { %1106 = vmatprep.mubr.bf16.mxu0 %v375_v53  ;;  %1187 = vmatprep.mubr.bf16.mxu1 %v375_v53 }
 0x15b   :  { %1079 = vmatpush1.bf16.msra.mxu0 %v1500_v52  ;;  %1383 = vmatpush3.bf16.msra.mxu1 %v1504_v54  ;;  %v1204_v54 = vld [vmem:[%s1877_s11] sm:$0x7] }
 0x15c   :  { %1080 = vmatprep.subr.bf16.mxu0 %v1507_v55  ;;  %1384 = vmatprep.subr.bf16.mxu1 %v1508_v56 }
 0x15f   :  { %1081 = vmatpush1.bf16.msra.mxu0 %v1505_v57  ;;  %1385 = vmatpush3.bf16.msra.mxu1 %v1509_v58  ;;  %v1209_v58 = vrot.slane %v1204_v54, %v1827_v14  ;;  %v1355_v14 = vld [vmem:[#allocation2] ss:$0 sm:$0xff] }
 0x160   :  { %1082 = vmatprep.subr.bf16.mxu0 %v1512_v59  ;;  %1386 = vmatprep.subr.bf16.mxu1 %v1513_v60 }
 0x163   :  { %1083 = vmatpush1.bf16.msra.mxu0 %v1510_v62  ;;  %1387 = vmatpush3.bf16.msra.mxu1 %v1514_v63  ;;  %v1213_v62 = vrot.slane %v1204_v54, %v1835_v16 }
 0x164   :  { %1084 = vmatprep.subr.bf16.mxu0 %v1517_v0  ;;  %1388 = vmatprep.subr.bf16.mxu1 %v1518_v1  ;;  %v1217_v1 = vrot.slane %v1204_v54, %v1846_v61 }
 0x167   :  { %1085 = vmatpush1.bf16.msra.mxu0 %v1515_v3  ;;  %1389 = vmatpush3.bf16.msra.mxu1 %v1519_v4 }
 0x168   :  { %1086 = vmatprep.subr.bf16.mxu0 %v1522_v5  ;;  %1390 = vmatprep.subr.bf16.mxu1 %v1523_v6 }
 0x16b   :  { %1087 = vmatpush1.bf16.msra.mxu0 %v1520_v8  ;;  %1391 = vmatpush3.bf16.msra.mxu1 %v1524_v9 }
 0x16c   :  { %1088 = vmatprep.subr.bf16.mxu0 %v1527_v10  ;;  %1392 = vmatprep.subr.bf16.mxu1 %v1528_v11 }
 0x16f   :  { %1089 = vmatpush1.bf16.msra.mxu0 %v1525_v13  ;;  %1393 = vmatpush3.bf16.msra.mxu1 %v1529_v15 }
 0x170   :  { %1090 = vmatprep.subr.bf16.mxu0 %v1532_v17 }
 0x172   :  { %1188 = vmatmul.mubr.bf16.vlgmr.msra.gmra.mrb[20].mxu1 %v374_v20 }
 0x173   :  { %1091 = vmatpush1.bf16.msra.mxu0 %v1530_v19 }
 0x174   :  { %1092 = vmatprep.subr.bf16.mxu0 %v1535_v21 }
 0x177   :  { %1093 = vmatpush1.bf16.msra.mxu0 %v1533_v22 }
 0x178   :  { %1094 = vmatprep.subr.bf16.mxu0 %v1538_v23 }
 0x17b   :  { %1095 = vmatpush1.bf16.msra.mxu0 %v1536_v24 }
 0x17c   :  { %1096 = vmatprep.subr.bf16.mxu0 %v1541_v25 }
 0x17f   :  { %1097 = vmatpush1.bf16.msra.mxu0 %v1539_v26 }
 0x180   :  { %1098 = vmatprep.subr.bf16.mxu0 %v1544_v27 }
 0x183   :  { %1099 = vmatpush1.bf16.msra.mxu0 %v1542_v28 }
 0x184   :  { %1100 = vmatprep.subr.bf16.mxu0 %v1547_v29 }
 0x187   :  { %1101 = vmatpush1.bf16.msra.mxu0 %v1545_v30 }
 0x188   :  { %1102 = vmatprep.subr.bf16.mxu0 %v1550_v31 }
 0x18b   :  { %1103 = vmatpush1.bf16.msra.mxu0 %v1548_v32 }
 0x18c   :  { %1104 = vmatprep.subr.bf16.mxu0 %v1553_v33 }
 0x18f   :  { %1105 = vmatpush1.bf16.msra.mxu0 %v1551_v34 }
 0x192   :  { %1107 = vmatmul.mubr.bf16.vlgmr.msra.gmra.mrb[0].mxu0 %v374_v20 }
 0x225   :  { %v1372_v35 = vpop.f32.mrb[16].mxu1 }
 0x226   :  { %v1373_v36 = vpop.f32.mrb[17].mxu1 }
 0x227   :  { %v1374_v37 = vadd.f32 %v1373_v36, %v1372_v35  ;;  %v1375_v38 = vpop.f32.mrb[18].mxu1 }
 0x228   :  { %v1376_v39 = vpop.f32.mrb[19].mxu1 }
 0x229   :  { %v1150_v44 = vadd.f32 %v1374_v37, %v517_v41 }
 0x245   :  { %v1394_v42 = vpop.f32.mrb[20].mxu1 }
 0x246   :  { %v1395_v43 = vpop.f32.mrb[21].mxu1 }
 0x247   :  { %v1396_v45 = vadd.f32 %v1395_v43, %v1394_v42  ;;  %v1397_v46 = vpop.f32.mrb[22].mxu1 }
 0x248   :  { %v1398_v47 = vpop.f32.mrb[23].mxu1 }
 0x249   :  { %v1190_v48 = vadd.f32 %v1396_v45, %v1150_v44 }
 0x24b   :  { %v1200_v55 = vmul.f32 0.01, %v1190_v48  ;;  %vm1197_vm8 = vcmp.gt.f32.partialorder %v1190_v48, 0.0 }
 0x24d   :  { %v1203_v3 = vsel %vm1197_vm8, %v1190_v48, %v1200_v55 }
 0x24e   :  { %v1223_v6 = vmul.f32 %v1217_v1, %v1203_v3 }
 0x265   :  { %v1108_v51 = vpop.f32.mrb[0].mxu0 }
 0x266   :  { %v1400_v52 = vadd.f32 %v1108_v51, %v509_v49  ;;  %v1110_v53 = vpop.f32.mrb[1].mxu0 }
 0x267   :  { %v1401_v56 = vadd.f32 %v1110_v53, %v513_v50  ;;  %v1112_v57 = vpop.f32.mrb[2].mxu0 }
 0x268   :  { %vm1195_vm7 = vcmp.gt.f32.partialorder %v1400_v52, 0.0  ;;  %v1198_v59 = vmul.f32 0.01, %v1400_v52  ;;  %v1113_v60 = vpop.f32.mrb[3].mxu0 }
 0x269   :  { %vm1196_vm9 = vcmp.gt.f32.partialorder %v1401_v56, 0.0  ;;  %v1199_v63 = vmul.f32 0.01, %v1401_v56 }
 0x26a   :  { %v1201_v0 = vsel %vm1195_vm7, %v1400_v52, %v1198_v59 }
 0x26b   :  { %v1202_v2 = vsel %vm1196_vm9, %v1401_v56, %v1199_v63  ;;  %v1221_v4 = vmul.f32 %v1209_v58, %v1201_v0 }
 0x26c   :  { %v1222_v5 = vmul.f32 %v1213_v62, %v1202_v2 }
 0x26e   :  { %v1224_v7 = vadd.f32 %v1222_v5, %v1221_v4 }
 0x270   :  { %v1225_v8 = vadd.f32 %v1224_v7, %v1223_v6 }
 0x272   :  { %1226 = vadd.xlane.f32.xlu0 %v1225_v8 }
 0x2ff   :  { %v1227_v9 = vpop.xlane.xlu0 %1226 }
 0x300   :  { %v1235_v10 = vadd.f32 %v1355_v14, %v1227_v9 }
 0x302   :  { %1237 = vst.msk [vmem:[%s1879_s13] sm:$0xff] %vm1236_vm10, %v1235_v10 }
 0x303   :  { %1242 = vsyncpa [#allocation4], 1 }
 0x304   :  { %1243 = vsyncpa [#allocation6], 1 }
 0x305   :  { %1244 = vsyncpa [#allocation9], 1 }

</bundles_post_ra>
